<compile_context>
chip_gen: v6e
topology: v6e:2x2x1
jax: 0.10.0
libtpu: 0.0.40
codegen_flags: <defaults>
</compile_context>

<pallas_src>
import jax
import jax.numpy as jnp
from jax.experimental import pallas as pl
from jax.experimental.pallas import tpu as pltpu


def linear_relu_kernel(x_ref, w_ref, b_ref, o_ref):
    """grid = (M/tm, N/tn, K/tk); k (reduction) is last and 'arbitrary'.

    o_ref's index map ignores k, so the same (tm, tn) f32 output block stays
    resident in VMEM across all k steps and serves as the accumulator.
    """
    k = pl.program_id(2)

    @pl.when(k == 0)
    def _():
        # Fold the bias into the accumulator init: (1, tn) -> (tm, tn).
        o_ref[...] = jnp.broadcast_to(b_ref[...], o_ref.shape)

    # MXU matmul on the current (tm, tk) x (tk, tn) tiles, f32 accumulation.
    o_ref[...] += jnp.dot(
        x_ref[...], w_ref[...], preferred_element_type=jnp.float32
    )

    # Epilogue on the final K step: ReLU in place.
    @pl.when(k == pl.num_programs(2) - 1)
    def _():
        o_ref[...] = jnp.maximum(o_ref[...], 0.0)


def _round_up(x, m):
    return ((x + m - 1) // m) * m


def _pad2d(a, pad_r, pad_c):
    if pad_r == 0 and pad_c == 0:
        return a  # no copy in the aligned hot path
    return jnp.pad(a, ((0, pad_r), (0, pad_c)))


def my_linear(x, weight, bias, *, tm=512, tn=512, tk=512, compute_dtype=None):
    """relu(x @ weight + bias), computed in f32 (output dtype float32).

    x: (B, in_units), weight: (in_units, units), bias: (units,).

    Tile defaults (512^3) are a good cross-generation choice (v5e/v6e/v7x).
    On v6e (128 MiB VMEM) large problems can go to tm=tn=1024, tk=512; on v7x
    keep the double-buffered working set under ~48 MiB and make sure
    (M/tm)*(N/tn) >= 2 so both TensorCores get parallel tiles.
    # TODO(synk): outputs narrower than f32 would need a VMEM f32 scratch
    # accumulator + cast-on-store epilogue (not needed for this module).
    """
    B, K = x.shape
    K2, N = weight.shape
    assert K == K2, "weight first dim must match x last dim"
    assert bias.shape == (N,)

    if compute_dtype is not None:
        x = x.astype(compute_dtype)
        weight = weight.astype(compute_dtype)

    # Clamp tiles to the (padded) problem size while keeping TPU tiling rules:
    # second-to-last block dims multiples of 8, last dims multiples of 128.
    tm = min(tm, _round_up(B, 8))
    tn = min(tn, _round_up(N, 128))
    tk = min(tk, _round_up(K, 128))

    M_pad = _round_up(B, tm)
    K_pad = _round_up(K, tk)
    N_pad = _round_up(N, tn)

    # Zero-pad only when needed.  Padded K contributes 0 to the dot; padded
    # M rows / N cols are sliced off below.
    x_p = _pad2d(x, M_pad - B, K_pad - K)
    w_p = _pad2d(weight, K_pad - K, N_pad - N)
    b_p = bias.astype(jnp.float32)
    if N_pad != N:
        b_p = jnp.pad(b_p, (0, N_pad - N))
    b_p = b_p.reshape(1, N_pad)

    grid = (M_pad // tm, N_pad // tn, K_pad // tk)

    in_bytes = x_p.dtype.itemsize
    # Double-buffered X/W tiles + output/accumulator tile + headroom.
    vmem_needed = 2 * (tm * tk + tk * tn) * in_bytes + 2 * tm * tn * 4 + (4 << 20)
    vmem_limit = min(max(vmem_needed, 32 << 20), 96 << 20)

    out_p = pl.pallas_call(
        linear_relu_kernel,
        out_shape=jax.ShapeDtypeStruct((M_pad, N_pad), jnp.float32),
        grid_spec=pltpu.PrefetchScalarGridSpec(
            num_scalar_prefetch=0,
            grid=grid,
            in_specs=[
                pl.BlockSpec((tm, tk), lambda i, j, k: (i, k)),   # X tile
                pl.BlockSpec((tk, tn), lambda i, j, k: (k, j)),   # W tile
                pl.BlockSpec((1, tn), lambda i, j, k: (0, j)),    # bias tile
            ],
            out_specs=pl.BlockSpec((tm, tn), lambda i, j, k: (i, j)),
        ),
        compiler_params=pltpu.CompilerParams(
            dimension_semantics=("parallel", "parallel", "arbitrary"),
            vmem_limit_bytes=vmem_limit,
        ),
        cost_estimate=pl.CostEstimate(
            flops=2 * M_pad * N_pad * K_pad,
            transcendentals=0,
            bytes_accessed=in_bytes * (M_pad * K_pad + K_pad * N_pad)
            + 4 * (N_pad + M_pad * N_pad),
        ),
    )(x_p, w_p, b_p)

    if M_pad != B or N_pad != N:
        return out_p[:B, :N]
    return out_p


if __name__ == "__main__":
    # --- Test 1: small shapes matching the toy module (padding/clamp path) ---
    k_x, k_w, k_b = jax.random.split(jax.random.PRNGKey(0), 3)
    B1, K1, N1 = 2, 32, 64
    x1 = jax.random.normal(k_x, (B1, K1), dtype=jnp.float32)
    w1 = jax.random.normal(k_w, (K1, N1), dtype=jnp.float32)
    b1 = jax.random.normal(k_b, (N1,), dtype=jnp.float32)

    out1 = jax.block_until_ready(my_linear(x1, w1, b1))
    ref1 = jnp.maximum(x1 @ w1 + b1, 0.0)
    assert out1.shape == (B1, N1)
    assert out1.dtype == jnp.float32
    assert jnp.allclose(out1, ref1, atol=1e-5, rtol=1e-5)

    # --- Test 2: tile-aligned shapes exercising the aligned (no-pad) path ---
    k_x2, k_w2, k_b2 = jax.random.split(jax.random.PRNGKey(1), 3)
    B2, K2, N2 = 512, 512, 512
    x2 = jax.random.normal(k_x2, (B2, K2), dtype=jnp.float32)
    w2 = jax.random.normal(k_w2, (K2, N2), dtype=jnp.float32)
    b2 = jax.random.normal(k_b2, (N2,), dtype=jnp.float32)

    out2 = jax.block_until_ready(my_linear(x2, w2, b2))
    ref2 = jnp.maximum(x2 @ w2 + b2, 0.0)
    assert out2.shape == (B2, N2)
    assert jnp.allclose(out2, ref2, atol=1e-4, rtol=1e-4)

    # --- Test 3: bf16 compute path (MXU-native rate), f32 accumulation ---
    out3 = jax.block_until_ready(
        my_linear(x2, w2, b2, compute_dtype=jnp.bfloat16)
    )
    x2b = x2.astype(jnp.bfloat16).astype(jnp.float32)
    w2b = w2.astype(jnp.bfloat16).astype(jnp.float32)
    ref3 = jnp.maximum(x2b @ w2b + b2, 0.0)
    assert jnp.allclose(out3, ref3, atol=5e-2, rtol=5e-2)

    print("KERNEL_OK")
</pallas_src>

<mosaic_0001>
module attributes {stable_mosaic.version = 11 : i64} {
  func.func @linear_relu_kernel(%arg0: i32, %arg1: i32, %arg2: i32, %arg3: memref<8x128xf32, #tpu.memory_space<vmem>>, %arg4: memref<128x128xf32, #tpu.memory_space<vmem>>, %arg5: memref<1x128xf32, #tpu.memory_space<vmem>>, %arg6: memref<8x128xf32, #tpu.memory_space<vmem>>) attributes {dimension_semantics = [#tpu.dimension_semantics<parallel>, #tpu.dimension_semantics<parallel>, #tpu.dimension_semantics<arbitrary>], iteration_bounds = array<i64: 1, 1, 1>, scalar_prefetch = 0 : i64, scratch_operands = 0 : i64, tpu.core_type = #tpu.core_type<tc>, window_params = [{transform_indices = @transform_0, window_bounds = array<i64: 8, 128>}, {transform_indices = @transform_1, window_bounds = array<i64: 128, 128>}, {transform_indices = @transform_2, window_bounds = array<i64: 1, 128>}, {transform_indices = @transform_3, window_bounds = array<i64: 8, 128>}]} {
    %c0_i32 = arith.constant 0 : i32
    %0 = arith.cmpi eq, %arg2, %c0_i32 : i32
    %1 = arith.extui %0 : i1 to i32
    %c0_i32_0 = arith.constant 0 : i32
    %2 = arith.cmpi ne, %1, %c0_i32_0 : i32
    scf.if %2 {
      %c0_10 = arith.constant 0 : index
      %c0_11 = arith.constant 0 : index
      %12 = vector.load %arg5[%c0_10, %c0_11] : memref<1x128xf32, #tpu.memory_space<vmem>>, vector<1x128xf32>
      %13 = vector.shape_cast %12 : vector<1x128xf32> to vector<1x128xf32>
      %14 = vector.broadcast %13 : vector<1x128xf32> to vector<8x128xf32>
      %c0_12 = arith.constant 0 : index
      %c0_13 = arith.constant 0 : index
      %15 = vector.load %arg6[%c0_12, %c0_13] : memref<8x128xf32, #tpu.memory_space<vmem>>, vector<8x128xf32>
      tpu.vector_store %arg6[%c0_12, %c0_13], %14 {strides = array<i32>} : memref<8x128xf32, #tpu.memory_space<vmem>>, vector<8x128xf32>,
    } else {
    }
    %c0 = arith.constant 0 : index
    %c0_1 = arith.constant 0 : index
    %3 = vector.load %arg6[%c0, %c0_1] : memref<8x128xf32, #tpu.memory_space<vmem>>, vector<8x128xf32>
    %c0_2 = arith.constant 0 : index
    %c0_3 = arith.constant 0 : index
    %4 = vector.load %arg3[%c0_2, %c0_3] : memref<8x128xf32, #tpu.memory_space<vmem>>, vector<8x128xf32>
    %c0_4 = arith.constant 0 : index
    %c0_5 = arith.constant 0 : index
    %5 = vector.load %arg4[%c0_4, %c0_5] : memref<128x128xf32, #tpu.memory_space<vmem>>, vector<128x128xf32>
    %cst = arith.constant dense<0.000000e+00> : vector<8x128xf32>
    %6 = tpu.matmul %4, %5, %cst {dimension_numbers = #tpu.dot_dimension_numbers<[1], [0], [0], [1], [0, 0, 1, 1], [], []>} : vector<8x128xf32>, vector<128x128xf32>, vector<8x128xf32> -> vector<8x128xf32>
    %7 = arith.addf %3, %6 : vector<8x128xf32>
    %c0_6 = arith.constant 0 : index
    %c0_7 = arith.constant 0 : index
    %8 = vector.load %arg6[%c0_6, %c0_7] : memref<8x128xf32, #tpu.memory_space<vmem>>, vector<8x128xf32>
    tpu.vector_store %arg6[%c0_6, %c0_7], %7 {strides = array<i32>} : memref<8x128xf32, #tpu.memory_space<vmem>>, vector<8x128xf32>,
    %c0_i32_8 = arith.constant 0 : i32
    %9 = arith.cmpi eq, %arg2, %c0_i32_8 : i32
    %10 = arith.extui %9 : i1 to i32
    %c0_i32_9 = arith.constant 0 : i32
    %11 = arith.cmpi ne, %10, %c0_i32_9 : i32
    scf.if %11 {
      %c0_10 = arith.constant 0 : index
      %c0_11 = arith.constant 0 : index
      %12 = vector.load %arg6[%c0_10, %c0_11] : memref<8x128xf32, #tpu.memory_space<vmem>>, vector<8x128xf32>
      %cst_12 = arith.constant 0.000000e+00 : f32
      %13 = vector.broadcast %cst_12 : f32 to vector<8x128xf32>
      %14 = arith.maximumf %12, %13 : vector<8x128xf32>
      %c0_13 = arith.constant 0 : index
      %c0_14 = arith.constant 0 : index
      %15 = vector.load %arg6[%c0_13, %c0_14] : memref<8x128xf32, #tpu.memory_space<vmem>>, vector<8x128xf32>
      tpu.vector_store %arg6[%c0_13, %c0_14], %14 {strides = array<i32>} : memref<8x128xf32, #tpu.memory_space<vmem>>, vector<8x128xf32>,
    } else {
    }
    return
  }
  func.func @transform_0(%arg0: i32, %arg1: i32, %arg2: i32) -> (i32, i32) {
    %c0_i32 = arith.constant 0 : i32
    return %arg0, %arg2 : i32, i32
  }
  func.func @transform_1(%arg0: i32, %arg1: i32, %arg2: i32) -> (i32, i32) {
    %c0_i32 = arith.constant 0 : i32
    return %arg2, %arg1 : i32, i32
  }
  func.func @transform_2(%arg0: i32, %arg1: i32, %arg2: i32) -> (i32, i32) {
    %c0_i32 = arith.constant 0 : i32
    %c0_i32_0 = arith.constant 0 : i32
    return %c0_i32, %arg1 : i32, i32
  }
  func.func @transform_3(%arg0: i32, %arg1: i32, %arg2: i32) -> (i32, i32) {
    %c0_i32 = arith.constant 0 : i32
    return %arg0, %arg1 : i32, i32
  }
}

</mosaic_0001>

<bundles_post_ra>
// kernel: tpu_custom_call.1
= control target key start
LH: loop header
LB: loop body
LE: loop exit
PB: predicated region body
PF: predicated region fallthrough
CT: control target
= control target key end

     0   :  { %8 = vsyncpa [#allocation3], 0  ;;  %s330_s0 = inlined_call_operand.hbm [shape: f32[8,128], index: 0, kind: input, shape index: {}]   ;;  %s331_s1 = inlined_call_operand.hbm [shape: f32[128,128], index: 1, kind: input, shape index: {}]   ;;  %s332_s2 = inlined_call_operand.vmem [shape: f32[1,128], index: 2, kind: input, shape index: {}]   ;;  %s333_s3 = inlined_call_operand.hbm [shape: f32[8,128], index: 3, kind: output, shape index: {}]  }
   0x1   :  { %9 = vsyncpa [#allocation6], 0 }
   0x2   :  { %10 = vsyncpa [#allocation4], 0  ;;  %s291_s12 = smov [#allocation2]   ;;  %s292_s14 = smov [#allocation5]  }
   0x3   :  { %s17_s13 = sshll.u32 %s291_s12, 4  ;;  %s26_s15 = sshll.u32 %s292_s14, 4  ;;  %s18_s13 = int_to_ptr.vmem [resolvable:$true] %s17_s13  ;;  %s27_s15 = int_to_ptr.vmem [resolvable:$true] %s26_s15 }
   0x4   :  { %s233_s16 = scalar_lea.vmem %s18_s13, 128  ;;  %p238_p1 = scmp.lt.s32.totalorder %s18_s13, %s18_s13 }
   0x5   :  { %p234_p0 = scmp.ne.s32.totalorder %s18_s13, %s233_s16  ;;  %p239_p2 = scmp.lt.s32.totalorder %s233_s16, %s233_s16 }
   0x7   :  { %p240_p3 = por %p239_p2, %p238_p1 }
   0x9   :  { %p241_p4 = pnand %p240_p3, %p234_p0 }
   0xb   :  { %244 = shalt.err (!%p241_p4)
}
   0xc   :  { %20 = dma.hbm_to_vmem [thread:$0]  %s330_s0, 128, %s18_s13, [#allocation3]  }
   0xd   :  { %s253_s19 = scalar_lea.vmem %s27_s15, 2048  ;;  %p258_p6 = scmp.lt.s32.totalorder %s27_s15, %s27_s15 }
   0xe   :  { %p254_p5 = scmp.ne.s32.totalorder %s27_s15, %s253_s19  ;;  %p259_p7 = scmp.lt.s32.totalorder %s253_s19, %s253_s19 }
  0x10   :  { %p260_p8 = por %p259_p7, %p258_p6 }
  0x12   :  { %p261_p9 = pnand %p260_p8, %p254_p5 }
  0x14   :  { %264 = shalt.err (!%p261_p9)
}
  0x15   :  { %s293_s20 = smov 128   ;;  %s294_s21 = smov 8  }
  0x16   :  { %32 = dma.hbm_to_vmem [thread:$0]  %s331_s1, 2048, %s27_s15, [#allocation6], %s293_s20, %s293_s20, %s294_s21  }
  0x17   :  { %285 = dma.done.wait [#allocation3], 128  }
  0x18   :  { %286 = vsyncadd [#allocation3], 4294967168 }
  0x19   :  { %287 = dma.done.wait [#allocation6], 2048  }
  0x1a   :  { %288 = vsyncadd [#allocation6], 4294965248  ;;  %v295_v0 = vmov 0.0   ;;  %vm296_vm0 = vmmov 0   ;;  %v70_v1 = vld [vmem:[#allocation5 + $0x78] sm:$0xff]  ;;  %v69_v2 = vld [vmem:[#allocation5 + $0x70] sm:$0xff] }
  0x1b   :  { %183 = vmatprep.subr.mxu0 %v295_v0  ;;  %215 = vmatprep.mubr.msk.f32.mxu0 %vm296_vm0, %v295_v0  ;;  %v68_v3 = vld [vmem:[#allocation5 + $0x68] sm:$0xff]  ;;  %v67_v4 = vld [vmem:[#allocation5 + $0x60] sm:$0xff]  ;;  %v66_v5 = vld [vmem:[#allocation5 + $0x58] sm:$0xff]  ;;  %s297_s24 = smov [#allocation7]  }
  0x1c   :  { %184 = vmatpush3.msra.mxu0 %v70_v1  ;;  %v65_v6 = vld [vmem:[#allocation5 + $0x50] sm:$0xff]  ;;  %v64_v7 = vld [vmem:[#allocation5 + $0x48] sm:$0xff]  ;;  %v63_v8 = vld [vmem:[#allocation5 + $0x40] sm:$0xff]  ;;  %s155_s25 = sshll.u32 %s297_s24, 4  ;;  %s156_s25 = int_to_ptr.vmem [resolvable:$true] %s155_s25 }
  0x1d   :  { %185 = vmatprep.subr.mxu0 %v295_v0  ;;  %v62_v9 = vld [vmem:[#allocation5 + $0x38] sm:$0xff]  ;;  %v61_v10 = vld [vmem:[#allocation5 + $0x30] sm:$0xff]  ;;  %v60_v11 = vld [vmem:[#allocation5 + $0x28] sm:$0xff]  ;;  %s265_s26 = scalar_lea.vmem %s156_s25, 128  ;;  %p270_p11 = scmp.lt.s32.totalorder %s156_s25, %s156_s25 }
  0x1e   :  { %186 = vmatpush3.msra.mxu0 %v69_v2  ;;  %v59_v12 = vld [vmem:[#allocation5 + $0x20] sm:$0xff]  ;;  %v58_v13 = vld [vmem:[#allocation5 + $0x18] sm:$0xff]  ;;  %v57_v14 = vld [vmem:[#allocation5 + $0x10] sm:$0xff]  ;;  %p266_p10 = scmp.ne.s32.totalorder %s156_s25, %s265_s26  ;;  %p271_p12 = scmp.lt.s32.totalorder %s265_s26, %s265_s26 }
  0x1f   :  { %187 = vmatprep.subr.mxu0 %v295_v0  ;;  %v56_v15 = vld [vmem:[#allocation5 + $0x8] sm:$0xff]  ;;  %v55_v16 = vld [vmem:[#allocation5] sm:$0xff]  ;;  %v54_v17 = vld [vmem:[#allocation2] sm:$0xff] }
  0x20   :  { %188 = vmatpush3.msra.mxu0 %v68_v3  ;;  %v165_v18 = vld [vmem:[%s332_s2] ss:$0 sm:$0xff]  ;;  %p272_p13 = por %p271_p12, %p270_p11 }
  0x21   :  { %189 = vmatprep.subr.mxu0 %v295_v0 }
  0x22   :  { %190 = vmatpush3.msra.mxu0 %v67_v4  ;;  %p273_p0 = pnand %p272_p13, %p266_p10 }
  0x23   :  { %191 = vmatprep.subr.mxu0 %v295_v0 }
  0x24   :  { %192 = vmatpush3.msra.mxu0 %v66_v5 }
  0x25   :  { %193 = vmatprep.subr.mxu0 %v295_v0 }
  0x26   :  { %194 = vmatpush3.msra.mxu0 %v65_v6 }
  0x27   :  { %195 = vmatprep.subr.mxu0 %v295_v0 }
  0x28   :  { %196 = vmatpush3.msra.mxu0 %v64_v7 }
  0x29   :  { %197 = vmatprep.subr.mxu0 %v295_v0 }
  0x2a   :  { %198 = vmatpush3.msra.mxu0 %v63_v8 }
  0x2b   :  { %199 = vmatprep.subr.mxu0 %v295_v0 }
  0x2c   :  { %200 = vmatpush3.msra.mxu0 %v62_v9 }
  0x2d   :  { %201 = vmatprep.subr.mxu0 %v295_v0 }
  0x2e   :  { %202 = vmatpush3.msra.mxu0 %v61_v10 }
  0x2f   :  { %203 = vmatprep.subr.mxu0 %v295_v0 }
  0x30   :  { %204 = vmatpush3.msra.mxu0 %v60_v11 }
  0x31   :  { %205 = vmatprep.subr.mxu0 %v295_v0 }
  0x32   :  { %206 = vmatpush3.msra.mxu0 %v59_v12 }
  0x33   :  { %207 = vmatprep.subr.mxu0 %v295_v0 }
  0x34   :  { %208 = vmatpush3.msra.mxu0 %v58_v13 }
  0x35   :  { %209 = vmatprep.subr.mxu0 %v295_v0 }
  0x36   :  { %210 = vmatpush3.msra.mxu0 %v57_v14 }
  0x37   :  { %211 = vmatprep.subr.mxu0 %v295_v0 }
  0x38   :  { %212 = vmatpush3.msra.mxu0 %v56_v15 }
  0x39   :  { %213 = vmatprep.subr.mxu0 %v295_v0 }
  0x3a   :  { %214 = vmatpush3.msra.mxu0 %v55_v16 }
  0x3b   :  { %216 = vmatmul.mubr.f32.vlgmr.msra.gmra.mxu0 %v54_v17 }
  0xfb   :  { %v137_v19 = vpop.f32.mrf.mxu0 }
  0xfc   :  { %v141_v20 = vadd.f32 %v165_v18, %v137_v19 }
  0xfd   :  { %v217_v21 = vpop.f32.mrf.mxu0 }
  0xfe   :  { %v147_v22 = vmax.f32 %v141_v20, 0.0 }
 0x100   :  { %148 = vst [vmem:[#allocation7] sm:$0xff] %v147_v22 }
 0x101   :  { %276 = shalt.err (!%p273_p0)
}
 0x102   :  { %158 = dma.vmem_to_hbm [thread:$0]  %s156_s25, 128, %s333_s3, [#allocation4]  }
 0x103   :  { %289 = dma.done.wait [#allocation4], 128  }
 0x104   :  { %290 = vsyncadd [#allocation4], 4294967168 }
 0x105   :  { %162 = vsyncpa [#allocation3], 1 }
 0x106   :  { %163 = vsyncpa [#allocation6], 1 }
 0x107   :  { %164 = vsyncpa [#allocation4], 1 }

</bundles_post_ra>
